<compile_context>
chip_gen: v7x
topology: tpu7x:2x2x1
jax: 0.10.0
libtpu: 0.0.40
codegen_flags: <defaults>
</compile_context>

<pallas_src>
import jax
import jax.numpy as jnp
from jax.experimental import pallas as pl
from jax.experimental.pallas import tpu as pltpu

# Sizes implied by the hard-coded weights in Net.__init__:
#   hidden : Linear(3 -> 2),  w1 shape (2, 3)
#   hidden2: Linear(2 -> 4),  w2 shape (4, 2)
#   predict: Linear(4 -> 1),  w3 shape (1, 4)
N_FEATURE, N_HIDDEN, N_HIDDEN2, N_OUTPUT = 3, 2, 4, 1

_MAX_BLOCK_ROWS = 512          # 512 sublane-rows * 128 lanes = 64K rows / step


def _affine(ws, xs, b):
    """Compile-time-unrolled dot(ws, xs) + b over Python-float weights.

    Zero weights are dropped and +-1 weights skip the multiply, so the per
    element VALU cost is the minimum the model allows.
    """
    acc = None
    for w, v in zip(ws, xs):
        if w == 0.0:
            continue
        term = v if w == 1.0 else (-v if w == -1.0 else w * v)
        acc = term if acc is None else acc + term
    if acc is None:
        return jnp.full_like(xs[0], b)
    return acc + b


def _sigmoid(z):
    # tanh-form sigmoid == 1/(1+exp(-z)) mathematically, but costs one EUP op
    # plus ~3 VALU ops instead of exp + exact reciprocal (2 EUP + ~6 VALU).
    return 0.5 * jnp.tanh(0.5 * z) + 0.5


def _make_kernel(w1, b1, w2, b2, w3, b3):
    """Build a kernel with all weights/biases baked in as immediates.

    xt_ref : (3, block_rows, 128) VMEM  -- feature on the leading axis,
                                           batch on (sublane, lane)
    o_ref  : (block_rows, 128) VMEM     -- lane-dense output slab
    """

    def kernel(xt_ref, o_ref):
        # Load the three feature slabs once; each is a dense (block_rows, 128)
        # tile, so all following ops are full-vreg VPU/EUP work.
        x = [xt_ref[f] for f in range(N_FEATURE)]

        # hidden: Linear(3 -> 2) + sigmoid -- unrolled VPU FMAs, no MXU.
        h1 = [_sigmoid(_affine(w1[j], x, b1[j])) for j in range(N_HIDDEN)]

        # hidden2: Linear(2 -> 4) + sigmoid.
        h2 = [_sigmoid(_affine(w2[j], h1, b2[j])) for j in range(N_HIDDEN2)]

        # predict: Linear(4 -> 1), no activation.  Full-width unmasked store.
        o_ref[...] = _affine(w3[0], h2, b3[0])

    return kernel


def make_params():
    """Deterministic parameters matching the PyTorch module (as Python floats)."""
    # Hard-coded weights from Net.__init__ (same values, same (out, in) layout).
    w1 = ((1.0, -2.0, -1.0),
          (2.0, -1.0,  1.0))                       # (2, 3)
    w2 = ((0.10, 0.0),
          (0.25, 1.0),
          (0.50, 2.0),
          (0.10, 1.0))                             # (4, 2)
    w3 = ((-1.0, -0.5, 0.25, 3.0),)                # (1, 4)

    # Biases: torch.nn.Linear default init is U(-1/sqrt(fan_in), 1/sqrt(fan_in)).
    # Reproduced deterministically with a fixed JAX key (not bit-identical to
    # torch's RNG; the hard-coded weights match exactly).
    key = jax.random.PRNGKey(0)
    k1, k2, k3 = jax.random.split(key, 3)
    b1 = tuple(float(v) for v in jax.random.uniform(
        k1, (N_HIDDEN,), jnp.float32, -1.0 / N_FEATURE ** 0.5, 1.0 / N_FEATURE ** 0.5))
    b2 = tuple(float(v) for v in jax.random.uniform(
        k2, (N_HIDDEN2,), jnp.float32, -1.0 / N_HIDDEN ** 0.5, 1.0 / N_HIDDEN ** 0.5))
    b3 = tuple(float(v) for v in jax.random.uniform(
        k3, (N_OUTPUT,), jnp.float32, -1.0 / N_HIDDEN2 ** 0.5, 1.0 / N_HIDDEN2 ** 0.5))
    return w1, b1, w2, b2, w3, b3


def _pick_block_rows(n):
    """Largest tile that amortizes per-step overhead while keeping >=2 grid
    steps when possible (so v7x's two TensorCores both get work)."""
    rows = pl.cdiv(n, 128)                              # 128-lane rows needed
    target = min(_MAX_BLOCK_ROWS, max(8, pl.cdiv(rows, 2)))
    return pl.cdiv(target, 8) * 8                       # sublane dim 8-aligned


def net_forward(x, params, *, block_rows=None):
    """Pallas forward of Net.  x: (n, 3) float32 -> (n, 1) float32."""
    n = x.shape[0]
    if block_rows is None:
        block_rows = _pick_block_rows(n)
    bm = block_rows * 128
    n_pad = pl.cdiv(n, bm) * bm                          # pad ragged batches
    rows = n_pad // 128

    # One fused pad+transpose pass to a feature-major, lane-aligned layout;
    # the trailing reshape is a free row-major reshape.
    # TODO(synk): feed feature-major x from upstream to drop this HBM pass.
    xt = jnp.pad(x, ((0, n_pad - n), (0, 0))).T.reshape(N_FEATURE, rows, 128)

    kernel = _make_kernel(*params)

    out = pl.pallas_call(
        kernel,
        out_shape=jax.ShapeDtypeStruct((rows, 128), jnp.float32),
        grid=(rows // block_rows,),
        in_specs=[
            # If profiling shows exposed input DMA at very large tiles, add
            # pipeline_mode=pl.Buffered(3) here (costs <1 MiB extra VMEM).
            pl.BlockSpec((N_FEATURE, block_rows, 128), lambda i: (0, i, 0)),
        ],
        out_specs=pl.BlockSpec((block_rows, 128), lambda i: (i, 0)),
        compiler_params=pltpu.CompilerParams(
            dimension_semantics=("parallel",),
            vmem_limit_bytes=32 * 1024 * 1024,           # headroom for v5e
        ),
    )(xt)

    # (rows, 128) -> (n_pad, 1); drop the padded rows.
    return out.reshape(n_pad, 1)[:n]


def net_forward_ref(x, params):
    """Pure-JAX reference of the PyTorch forward."""
    w1, b1, w2, b2, w3, b3 = params
    w1 = jnp.asarray(w1, jnp.float32); b1 = jnp.asarray(b1, jnp.float32)
    w2 = jnp.asarray(w2, jnp.float32); b2 = jnp.asarray(b2, jnp.float32)
    w3 = jnp.asarray(w3, jnp.float32); b3 = jnp.asarray(b3, jnp.float32)
    h1 = jax.nn.sigmoid(x @ w1.T + b1)
    h2 = jax.nn.sigmoid(h1 @ w2.T + b2)
    return h2 @ w3.T + b3


if __name__ == "__main__":
    params = make_params()

    # 2048 rows -> two parallel grid steps (block_rows auto-picked = 8).
    x = jax.random.normal(jax.random.PRNGKey(0), (2048, N_FEATURE), jnp.float32)
    out = jax.block_until_ready(net_forward(x, params))
    ref = net_forward_ref(x, params)
    assert out.shape == (2048, N_OUTPUT)
    assert jnp.allclose(out, ref, atol=2e-5, rtol=1e-5)

    # Medium batch exercises a larger auto-picked tile (block_rows = 32).
    x1 = jax.random.normal(jax.random.PRNGKey(2), (8192, N_FEATURE), jnp.float32)
    out1 = jax.block_until_ready(net_forward(x1, params))
    assert out1.shape == (8192, N_OUTPUT)
    assert jnp.allclose(out1, net_forward_ref(x1, params), atol=2e-5, rtol=1e-5)

    # Ragged batch exercises the zero-padding / single-grid-step path.
    x2 = jax.random.normal(jax.random.PRNGKey(1), (100, N_FEATURE), jnp.float32)
    out2 = jax.block_until_ready(net_forward(x2, params))
    assert out2.shape == (100, N_OUTPUT)
    assert jnp.allclose(out2, net_forward_ref(x2, params), atol=2e-5, rtol=1e-5)

    print("KERNEL_OK")
</pallas_src>

<mosaic_0001>
module attributes {stable_mosaic.version = 11 : i64} {
  func.func @kernel(%arg0: i32, %arg1: memref<3x8x128xf32, #tpu.memory_space<vmem>>, %arg2: memref<8x128xf32, #tpu.memory_space<vmem>>) attributes {dimension_semantics = [#tpu.dimension_semantics<parallel>], iteration_bounds = array<i64: 2>, scalar_prefetch = 0 : i64, scratch_operands = 0 : i64, tpu.core_type = #tpu.core_type<tc>, window_params = [{transform_indices = @transform_0, window_bounds = array<i64: 3, 8, 128>}, {transform_indices = @transform_1, window_bounds = array<i64: 8, 128>}]} {
    %c0 = arith.constant 0 : index
    %c0_0 = arith.constant 0 : index
    %c0_1 = arith.constant 0 : index
    %0 = vector.load %arg1[%c0, %c0_0, %c0_1] : memref<3x8x128xf32, #tpu.memory_space<vmem>>, vector<1x8x128xf32>
    %1 = vector.shape_cast %0 : vector<1x8x128xf32> to vector<8x128xf32>
    %c1 = arith.constant 1 : index
    %c0_2 = arith.constant 0 : index
    %c0_3 = arith.constant 0 : index
    %2 = vector.load %arg1[%c1, %c0_2, %c0_3] : memref<3x8x128xf32, #tpu.memory_space<vmem>>, vector<1x8x128xf32>
    %3 = vector.shape_cast %2 : vector<1x8x128xf32> to vector<8x128xf32>
    %c2 = arith.constant 2 : index
    %c0_4 = arith.constant 0 : index
    %c0_5 = arith.constant 0 : index
    %4 = vector.load %arg1[%c2, %c0_4, %c0_5] : memref<3x8x128xf32, #tpu.memory_space<vmem>>, vector<1x8x128xf32>
    %5 = vector.shape_cast %4 : vector<1x8x128xf32> to vector<8x128xf32>
    %cst = arith.constant -2.000000e+00 : f32
    %6 = vector.broadcast %cst : f32 to vector<8x128xf32>
    %7 = arith.mulf %6, %3 : vector<8x128xf32>
    %8 = arith.addf %1, %7 : vector<8x128xf32>
    %cst_6 = arith.constant 0.000000e+00 : f32
    %9 = vector.broadcast %cst_6 : f32 to vector<8x128xf32>
    %10 = arith.subf %9, %5 : vector<8x128xf32>
    %11 = arith.addf %8, %10 : vector<8x128xf32>
    %cst_7 = arith.constant 0.395270288 : f32
    %12 = vector.broadcast %cst_7 : f32 to vector<8x128xf32>
    %13 = arith.addf %11, %12 : vector<8x128xf32>
    %cst_8 = arith.constant 5.000000e-01 : f32
    %14 = vector.broadcast %cst_8 : f32 to vector<8x128xf32>
    %15 = arith.mulf %14, %13 : vector<8x128xf32>
    %16 = math.tanh %15 : vector<8x128xf32>
    %cst_9 = arith.constant 5.000000e-01 : f32
    %17 = vector.broadcast %cst_9 : f32 to vector<8x128xf32>
    %18 = arith.mulf %17, %16 : vector<8x128xf32>
    %cst_10 = arith.constant 5.000000e-01 : f32
    %19 = vector.broadcast %cst_10 : f32 to vector<8x128xf32>
    %20 = arith.addf %18, %19 : vector<8x128xf32>
    %cst_11 = arith.constant 2.000000e+00 : f32
    %21 = vector.broadcast %cst_11 : f32 to vector<8x128xf32>
    %22 = arith.mulf %21, %1 : vector<8x128xf32>
    %cst_12 = arith.constant 0.000000e+00 : f32
    %23 = vector.broadcast %cst_12 : f32 to vector<8x128xf32>
    %24 = arith.subf %23, %3 : vector<8x128xf32>
    %25 = arith.addf %22, %24 : vector<8x128xf32>
    %26 = arith.addf %25, %5 : vector<8x128xf32>
    %cst_13 = arith.constant -0.366757542 : f32
    %27 = vector.broadcast %cst_13 : f32 to vector<8x128xf32>
    %28 = arith.addf %26, %27 : vector<8x128xf32>
    %cst_14 = arith.constant 5.000000e-01 : f32
    %29 = vector.broadcast %cst_14 : f32 to vector<8x128xf32>
    %30 = arith.mulf %29, %28 : vector<8x128xf32>
    %31 = math.tanh %30 : vector<8x128xf32>
    %cst_15 = arith.constant 5.000000e-01 : f32
    %32 = vector.broadcast %cst_15 : f32 to vector<8x128xf32>
    %33 = arith.mulf %32, %31 : vector<8x128xf32>
    %cst_16 = arith.constant 5.000000e-01 : f32
    %34 = vector.broadcast %cst_16 : f32 to vector<8x128xf32>
    %35 = arith.addf %33, %34 : vector<8x128xf32>
    %cst_17 = arith.constant 1.000000e-01 : f32
    %36 = vector.broadcast %cst_17 : f32 to vector<8x128xf32>
    %37 = arith.mulf %36, %20 : vector<8x128xf32>
    %cst_18 = arith.constant -0.696791768 : f32
    %38 = vector.broadcast %cst_18 : f32 to vector<8x128xf32>
    %39 = arith.addf %37, %38 : vector<8x128xf32>
    %cst_19 = arith.constant 5.000000e-01 : f32
    %40 = vector.broadcast %cst_19 : f32 to vector<8x128xf32>
    %41 = arith.mulf %40, %39 : vector<8x128xf32>
    %42 = math.tanh %41 : vector<8x128xf32>
    %cst_20 = arith.constant 5.000000e-01 : f32
    %43 = vector.broadcast %cst_20 : f32 to vector<8x128xf32>
    %44 = arith.mulf %43, %42 : vector<8x128xf32>
    %cst_21 = arith.constant 5.000000e-01 : f32
    %45 = vector.broadcast %cst_21 : f32 to vector<8x128xf32>
    %46 = arith.addf %44, %45 : vector<8x128xf32>
    %cst_22 = arith.constant 2.500000e-01 : f32
    %47 = vector.broadcast %cst_22 : f32 to vector<8x128xf32>
    %48 = arith.mulf %47, %20 : vector<8x128xf32>
    %49 = arith.addf %48, %35 : vector<8x128xf32>
    %cst_23 = arith.constant -0.677562177 : f32
    %50 = vector.broadcast %cst_23 : f32 to vector<8x128xf32>
    %51 = arith.addf %49, %50 : vector<8x128xf32>
    %cst_24 = arith.constant 5.000000e-01 : f32
    %52 = vector.broadcast %cst_24 : f32 to vector<8x128xf32>
    %53 = arith.mulf %52, %51 : vector<8x128xf32>
    %54 = math.tanh %53 : vector<8x128xf32>
    %cst_25 = arith.constant 5.000000e-01 : f32
    %55 = vector.broadcast %cst_25 : f32 to vector<8x128xf32>
    %56 = arith.mulf %55, %54 : vector<8x128xf32>
    %cst_26 = arith.constant 5.000000e-01 : f32
    %57 = vector.broadcast %cst_26 : f32 to vector<8x128xf32>
    %58 = arith.addf %56, %57 : vector<8x128xf32>
    %cst_27 = arith.constant 5.000000e-01 : f32
    %59 = vector.broadcast %cst_27 : f32 to vector<8x128xf32>
    %60 = arith.mulf %59, %20 : vector<8x128xf32>
    %cst_28 = arith.constant 2.000000e+00 : f32
    %61 = vector.broadcast %cst_28 : f32 to vector<8x128xf32>
    %62 = arith.mulf %61, %35 : vector<8x128xf32>
    %63 = arith.addf %60, %62 : vector<8x128xf32>
    %cst_29 = arith.constant 0.11515446 : f32
    %64 = vector.broadcast %cst_29 : f32 to vector<8x128xf32>
    %65 = arith.addf %63, %64 : vector<8x128xf32>
    %cst_30 = arith.constant 5.000000e-01 : f32
    %66 = vector.broadcast %cst_30 : f32 to vector<8x128xf32>
    %67 = arith.mulf %66, %65 : vector<8x128xf32>
    %68 = math.tanh %67 : vector<8x128xf32>
    %cst_31 = arith.constant 5.000000e-01 : f32
    %69 = vector.broadcast %cst_31 : f32 to vector<8x128xf32>
    %70 = arith.mulf %69, %68 : vector<8x128xf32>
    %cst_32 = arith.constant 5.000000e-01 : f32
    %71 = vector.broadcast %cst_32 : f32 to vector<8x128xf32>
    %72 = arith.addf %70, %71 : vector<8x128xf32>
    %cst_33 = arith.constant 1.000000e-01 : f32
    %73 = vector.broadcast %cst_33 : f32 to vector<8x128xf32>
    %74 = arith.mulf %73, %20 : vector<8x128xf32>
    %75 = arith.addf %74, %35 : vector<8x128xf32>
    %cst_34 = arith.constant -0.195390597 : f32
    %76 = vector.broadcast %cst_34 : f32 to vector<8x128xf32>
    %77 = arith.addf %75, %76 : vector<8x128xf32>
    %cst_35 = arith.constant 5.000000e-01 : f32
    %78 = vector.broadcast %cst_35 : f32 to vector<8x128xf32>
    %79 = arith.mulf %78, %77 : vector<8x128xf32>
    %80 = math.tanh %79 : vector<8x128xf32>
    %cst_36 = arith.constant 5.000000e-01 : f32
    %81 = vector.broadcast %cst_36 : f32 to vector<8x128xf32>
    %82 = arith.mulf %81, %80 : vector<8x128xf32>
    %cst_37 = arith.constant 5.000000e-01 : f32
    %83 = vector.broadcast %cst_37 : f32 to vector<8x128xf32>
    %84 = arith.addf %82, %83 : vector<8x128xf32>
    %cst_38 = arith.constant 0.000000e+00 : f32
    %85 = vector.broadcast %cst_38 : f32 to vector<8x128xf32>
    %86 = arith.subf %85, %46 : vector<8x128xf32>
    %cst_39 = arith.constant -5.000000e-01 : f32
    %87 = vector.broadcast %cst_39 : f32 to vector<8x128xf32>
    %88 = arith.mulf %87, %58 : vector<8x128xf32>
    %89 = arith.addf %86, %88 : vector<8x128xf32>
    %cst_40 = arith.constant 2.500000e-01 : f32
    %90 = vector.broadcast %cst_40 : f32 to vector<8x128xf32>
    %91 = arith.mulf %90, %72 : vector<8x128xf32>
    %92 = arith.addf %89, %91 : vector<8x128xf32>
    %cst_41 = arith.constant 3.000000e+00 : f32
    %93 = vector.broadcast %cst_41 : f32 to vector<8x128xf32>
    %94 = arith.mulf %93, %84 : vector<8x128xf32>
    %95 = arith.addf %92, %94 : vector<8x128xf32>
    %cst_42 = arith.constant 0.402449489 : f32
    %96 = vector.broadcast %cst_42 : f32 to vector<8x128xf32>
    %97 = arith.addf %95, %96 : vector<8x128xf32>
    %c0_43 = arith.constant 0 : index
    %c0_44 = arith.constant 0 : index
    %98 = vector.load %arg2[%c0_43, %c0_44] : memref<8x128xf32, #tpu.memory_space<vmem>>, vector<8x128xf32>
    tpu.vector_store %arg2[%c0_43, %c0_44], %97 {strides = array<i32>} : memref<8x128xf32, #tpu.memory_space<vmem>>, vector<8x128xf32>,
    return
  }
  func.func @transform_0(%arg0: i32) -> (i32, i32, i32) {
    %c0_i32 = arith.constant 0 : i32
    %c0_i32_0 = arith.constant 0 : i32
    %c0_i32_1 = arith.constant 0 : i32
    return %c0_i32, %arg0, %c0_i32_0 : i32, i32, i32
  }
  func.func @transform_1(%arg0: i32) -> (i32, i32) {
    %c0_i32 = arith.constant 0 : i32
    %c0_i32_0 = arith.constant 0 : i32
    return %arg0, %c0_i32 : i32, i32
  }
}

</mosaic_0001>

<bundles_post_ra>
// kernel: tpu_custom_call.1
= control target key start
LH: loop header
LB: loop body
LE: loop exit
PB: predicated region body
PF: predicated region fallthrough
CT: control target
= control target key end

     0   :  { %6 = vsyncpa [#allocation3], 0  ;;  %s622_s0 = inlined_call_operand.hbm [shape: f32[3,16,128], index: 0, kind: input, shape index: {}]   ;;  %s623_s1 = inlined_call_operand.hbm [shape: f32[16,128], index: 1, kind: output, shape index: {}]  }
   0x1   :  { %8 = vsyncpa [#allocation3 + $0x1], 0 }
   0x2   :  { %9 = vsyncpa [#allocation4], 0 }
   0x3   :  { %11 = vsyncpa [#allocation4 + $0x1], 0  ;;  %s465_s6 = smov 0   ;;  %s467_s7 = smov 0  }
   0x4   :  { %s469_s8 = smov 0   ;;  %s471_s9 = smov 0  }
   0x5 LB: > { %s486_s10 = sadd.s32 4294967295, %s448_s9   ;;  %s277_s11 = sadd.s32 4294967294, %s448_s9   ;;  %s448_s9 = sphi %s471_s9, %s636_s9   ;;  %s444_s8 = sphi %s469_s8, %s635_s8   ;;  %s440_s7 = sphi %s467_s7, %s634_s7   ;;  %s436_s6 = sphi %s465_s6, %s633_s6  }
   0x6   : > { %s490_s12 = sadd.s32 1, %s448_s9   ;;  %s24_s13 = sadd.s32 1, %s444_s8 }
   0x7   : > { %s21_s14 = ssub.s32 %s448_s9, %s490_s12  ;;  %p31_p0 = scmp.ne.s32.totalorder %s444_s8, %s440_s7 }
   0x8   : > { %p22_p1 = scmp.eq.s32.totalorder %s21_s14, 0  ;;  %p32_p2 = scmp.eq.s32.totalorder %s448_s9, 0 }
   0x9   : > { %p37_p3 = scmp.ne.s32.totalorder %s440_s7, %s436_s6  ;;  %p38_p4 = scmp.eq.s32.totalorder %s486_s10, 0 }
   0xa   : > { %s502_s15 = scalar_select %p22_p1, %s444_s8, %s24_s13  }
   0xb   : > { %p33_p5 = por %p32_p2, %p31_p0  ;;  %p504_p6 = por %p38_p4, %p37_p3 }
   0xc   : > { %p61_p7 = scmp.eq.s32.totalorder %s486_s10, 1  ;;  %p67_p8 = scmp.eq.s32.totalorder %s277_s11, 1 }
   0xd   : > { %p303_p10 = scmp.lt.s32.totalorder %s448_s9, 2  ;;  %s87_s19 = sand.u32 1, %s444_s8  }
   0xe   : > { %p511_p11 = por %p61_p7, %p31_p0  ;;  %p515_p12 = por %p67_p8, %p37_p3 }
   0xf   : > { %s280_s20 = sshll.u32 %s448_s9, 7  ;;  %s289_s21 = smul.u32 24, %s87_s19 }
  0x10   : > { %s626_s17 = scalar_select %p511_p11, 1, 0 }
  0x11   : > { %s627_s18 = scalar_select %p515_p12, 1, 0 }
  0x12   : > { %s524_s24 = scalar_lea.hbm %s622_s0, %s280_s20  ;;  %p526_p13 = pnand %p303_p10, %p33_p5 }
  0x13   : > { %s91_s26 = scalar_lea.vmem [#allocation2], %s289_s21  ;;  %s533_s28 = scalar_lea.sflag [#allocation3], %s87_s19 }
  0x14   : > { %s97_s27 = sshll.u32 %s91_s26, 4  ;;  %s352_s29 = scalar_lea.hbm %s524_s24, 384  ;;  %s530_s27 = int_to_ptr.vmem [resolvable:$true] %s97_s27 }
  0x15   : > { %p353_p1 = scmp.ne.s32.totalorder %s524_s24, %s352_s29  ;;  %p354_p2 = pneg %p526_p13 }
  0x16   : > { %s357_s3 = scalar_lea.hbm %s622_s0, 768  ;;  %p358_p5 = scmp.lt.u32.totalorder %s524_s24, %s622_s0 }
  0x17   : > { %p355_p3 = pnand %p354_p2, %p353_p1  ;;  %p359_p7 = scmp.lt.u32.totalorder %s357_s3, %s352_s29 }
  0x18   : > { %p361_p10 = scmp.lt.u32.totalorder %s352_s29, %s524_s24 }
  0x19   : > { %p356_p4 = pneg %p355_p3  ;;  %p360_p8 = por %p359_p7, %p358_p5 }
  0x1b   : > { %p362_p9 = por %p361_p10, %p360_p8 }
  0x1d   : > { %p363_p0 = pnand %p362_p9, %p356_p4 }
  0x1f   : > { %366 = shalt.err (!%p363_p0)
}
  0x20   : > { %s367_s11 = scalar_lea.vmem %s530_s27, 384  ;;  %s450_s13 = smov [#allocation2]  }
  0x21   : > { %p368_p1 = scmp.ne.s32.totalorder %s530_s27, %s367_s11  ;;  %s372_s14 = sshll.u32 %s450_s13, 4  ;;  %s373_s14 = int_to_ptr.vmem [resolvable:$false] %s372_s14 }
  0x22   : > { %s374_s19 = scalar_lea.vmem %s373_s14, 768  ;;  %p375_p11 = scmp.lt.s32.totalorder %s530_s27, %s373_s14 }
  0x23   : > { %p370_p3 = pnand %p368_p1, %p354_p2  ;;  %p376_p5 = scmp.lt.s32.totalorder %s374_s19, %s367_s11 }
  0x25   : > { %p371_p12 = pneg %p370_p3  ;;  %p377_p7 = por %p376_p5, %p375_p11 }
  0x27   : > { %p378_p8 = pnand %p377_p7, %p371_p12 }
  0x29   : > { %381 = shalt.err (!%p378_p8)
}
  0x2a   : > { %s451_s20 = smov 256   ;;  %s452_s21 = smov 128  }
  0x2b   : > { %s453_s22 = smov 8   ;;  %p105_p9 = scmp.lt.s32.totalorder %s448_s9, 3 }
  0x2c   : > { %298 = dma.hbm_to_vmem [thread:$0]  (!%p526_p13), %s524_s24, 384, %s530_s27, %s533_s28, %s451_s20, %s452_s21, %s453_s22  }
  0x2d   : > { %p629_p0 = scmp.ge.s32.totalorder %s448_s9, 1 }
  0x2f   : > { %p106_p2 = pnand %p629_p0, %p105_p9 }
  0x30   : > { %s565_s23 = sand.u32 (!%p106_p2), 1, %s440_s7  }
  0x31   : > { %109 = sbr.rel (%p106_p2) target bundleno = 130 (0x82), region = 24  ;;  %s112_s29 = scalar_lea.sflag (!%p106_p2), [#allocation3], %s565_s23 }
  0x32   : > { %s290_s26 = smul.u32 (!%p106_p2), 24, %s565_s23 }
  0x34   : > { %s115_s30 = scalar_lea.vmem (!%p106_p2), [#allocation2], %s290_s26 }
  0x38   : > { %427 = dma.done.wait (%p504_p6), %s112_s29, 384  }
  0x39   : > { %429 = vsyncadd (%p504_p6), %s112_s29, 4294966912  ;;  %v134_v0 = vld [vmem:[%s115_s30] sm:$0xff]  ;;  %v283_v1 = vld [vmem:[%s115_s30 + $0x8] sm:$0xff]  ;;  %s282_s16 = sshll.u32 %s565_s23, 3  ;;  %s286_s27 = sshll.u32 %s486_s10, 7 }
  0x3a   : > { %v284_v2 = vld [vmem:[%s115_s30 + $0x10] sm:$0xff]  ;;  %v139_v3 = vmul.f32 -2.0, %v283_v1  ;;  %v148_v5 = vmul.f32 2.0, %v134_v0  ;;  %v149_v6 = vsub.f32 0.0, %v283_v1  ;;  %s133_s24 = scalar_lea.vmem [#allocation5], %s282_s16  ;;  %s580_s3 = scalar_lea.hbm %s623_s1, %s286_s27 }
  0x3b   : > { %v141_v4 = vsub.f32 0.0, %v284_v2  ;;  %s207_s25 = sshll.u32 %s133_s24, 4  ;;  %s194_s4 = scalar_lea.sflag [#allocation4], %s565_s23  ;;  %s575_s25 = int_to_ptr.vmem [resolvable:$true] %s207_s25 }
  0x3c   : > { %v140_v7 = vadd.f32 %v139_v3, %v134_v0  ;;  %v150_v8 = vadd.f32 %v149_v6, %v148_v5  ;;  %s382_s5 = scalar_lea.vmem %s575_s25, 128  ;;  %p630_p11 = scmp.ne.s32.totalorder %s626_s17, 0 }
  0x3d   : > { %p383_p6 = scmp.ne.s32.totalorder %s575_s25, %s382_s5  ;;  %s454_s10 = smov [#allocation5]  }
  0x3e   : > { %v142_v9 = vadd.f32 %v141_v4, %v140_v7  ;;  %v151_v10 = vadd.f32 %v284_v2, %v150_v8  ;;  %s386_s11 = sshll.u32 %s454_s10, 4  ;;  %s387_s11 = int_to_ptr.vmem [resolvable:$false] %s386_s11 }
  0x3f   : > { %p384_p12 = pnand %p383_p6, %p630_p11  ;;  %s388_s13 = scalar_lea.vmem %s387_s11, 256 }
  0x40   : > { %v143_v11 = vadd.f32 0.3952703, %v142_v9  ;;  %v152_v12 = vadd.f32 -0.36675754, %v151_v10  ;;  %p389_p4 = scmp.lt.s32.totalorder %s575_s25, %s387_s11  ;;  %p390_p10 = scmp.lt.s32.totalorder %s388_s13, %s382_s5 }
  0x41   : > { %p385_p13 = pneg %p384_p12 }
  0x42   : > { %v144_v13 = vmul.f32 0.5, %v143_v11  ;;  %v153_v14 = vmul.f32 0.5, %v152_v12  ;;  %p391_p1 = por %p390_p10, %p389_p4 }
  0x44   : > { %340 = vtanh.f32 %v144_v13  ;;  %p392_p3 = pnand %p391_p1, %p385_p13 }
  0x45   : > { %342 = vtanh.f32 %v153_v14 }
  0x4e   : > { %v341_v15 = vpop.eup %340 }
  0x4f   : > { %v343_v16 = vpop.eup %342  ;;  %v146_v17 = vmul.f32 0.5, %v341_v15 }
  0x50   : > { %v155_v18 = vmul.f32 0.5, %v343_v16 }
  0x51   : > { %v147_v19 = vadd.f32 0.5, %v146_v17 }
  0x52   : > { %v156_v20 = vadd.f32 0.5, %v155_v18 }
  0x53   : > { %v157_v21 = vmul.f32 0.1, %v147_v19  ;;  %v163_v22 = vmul.f32 0.25, %v147_v19  ;;  %v170_v23 = vmul.f32 0.5, %v147_v19 }
  0x54   : > { %v171_v24 = vmul.f32 2.0, %v156_v20 }
  0x55   : > { %v158_v25 = vadd.f32 -0.69679177, %v157_v21  ;;  %v164_v26 = vadd.f32 %v163_v22, %v156_v20  ;;  %v178_v27 = vadd.f32 %v157_v21, %v156_v20 }
  0x56   : > { %v172_v28 = vadd.f32 %v171_v24, %v170_v23 }
  0x57   : > { %v159_v29 = vmul.f32 0.5, %v158_v25  ;;  %v165_v30 = vadd.f32 -0.6775622, %v164_v26  ;;  %v179_v31 = vadd.f32 -0.1953906, %v178_v27 }
  0x58   : > { %v173_v32 = vadd.f32 0.11515446, %v172_v28 }
  0x59   : > { %344 = vtanh.f32 %v159_v29  ;;  %v166_v33 = vmul.f32 0.5, %v165_v30  ;;  %v180_v34 = vmul.f32 0.5, %v179_v31 }
  0x5a   : > { %v174_v35 = vmul.f32 0.5, %v173_v32 }
  0x5b   : > { %346 = vtanh.f32 %v166_v33 }
  0x5c   : > { %348 = vtanh.f32 %v174_v35 }
  0x5d   : > { %350 = vtanh.f32 %v180_v34 }
  0x63   : > { %v345_v36 = vpop.eup %344 }
  0x64   : > { %v161_v37 = vmul.f32 0.5, %v345_v36 }
  0x65   : > { %v347_v38 = vpop.eup %346 }
  0x66   : > { %v349_v39 = vpop.eup %348  ;;  %v162_v40 = vadd.f32 0.5, %v161_v37  ;;  %v168_v41 = vmul.f32 0.5, %v347_v38 }
  0x67   : > { %v351_v42 = vpop.eup %350  ;;  %v176_v43 = vmul.f32 0.5, %v349_v39 }
  0x68   : > { %v169_v44 = vadd.f32 0.5, %v168_v41  ;;  %v182_v45 = vmul.f32 0.5, %v351_v42  ;;  %v184_v46 = vsub.f32 0.0, %v162_v40 }
  0x69   : > { %v177_v47 = vadd.f32 0.5, %v176_v43 }
  0x6a   : > { %v183_v48 = vadd.f32 0.5, %v182_v45  ;;  %v185_v49 = vmul.f32 -0.5, %v169_v44 }
  0x6b   : > { %v187_v50 = vmul.f32 0.25, %v177_v47 }
  0x6c   : > { %v186_v51 = vadd.f32 %v185_v49, %v184_v46  ;;  %v189_v52 = vmul.f32 3.0, %v183_v48 }
  0x6e   : > { %v188_v53 = vadd.f32 %v187_v50, %v186_v51 }
  0x70   : > { %v190_v54 = vadd.f32 %v189_v52, %v188_v53 }
  0x72   : > { %v191_v55 = vadd.f32 0.4024495, %v190_v54 }
  0x74   : > { %192 = vst [vmem:[%s133_s24] sm:$0xff] %v191_v55 }
  0x75   : > { %395 = shalt.err (!%p392_p3)
}
  0x76   : > { %s396_s14 = scalar_lea.hbm %s580_s3, 128  ;;  %s400_s21 = scalar_lea.hbm %s623_s1, 256 }
  0x77   : > { %p397_p5 = scmp.ne.s32.totalorder %s580_s3, %s396_s14  ;;  %p401_p9 = scmp.lt.u32.totalorder %s580_s3, %s623_s1 }
  0x78   : > { %p402_p0 = scmp.lt.u32.totalorder %s400_s21, %s396_s14  ;;  %p404_p6 = scmp.lt.u32.totalorder %s396_s14, %s580_s3 }
  0x79   : > { %p398_p7 = pnand %p397_p5, %p630_p11 }
  0x7a   : > { %p403_p2 = por %p402_p0, %p401_p9 }
  0x7b   : > { %p399_p8 = pneg %p398_p7 }
  0x7c   : > { %p405_p12 = por %p404_p6, %p403_p2 }
  0x7e   : > { %p406_p13 = pnand %p405_p12, %p399_p8 }
  0x80   : > { %409 = shalt.err (!%p406_p13)
}
  0x81   : > { %293 = dma.vmem_to_hbm [thread:$0]  (%p630_p11), %s575_s25, 128, %s580_s3, %s194_s4  }
  0x82 PF: > { %s219_s26 = sand.u32 1, %s436_s6   ;;  %p631_p4 = scmp.ne.s32.totalorder %s627_s18, 0 }
  0x83   : > { %p632_p10 = scmp.ge.s32.totalorder %s448_s9, 2  ;;  %s220_s29 = scalar_lea.sflag [#allocation4], %s219_s26 }
  0x85   : > { %p300_p1 = pnand %p632_p10, %p631_p4 }
  0x87   : > { %431 = dma.done.wait (!%p300_p1), %s220_s29, 128  }
  0x88   : > { %433 = vsyncadd (!%p300_p1), %s220_s29, 4294967168  ;;  %p14_p3 = scmp.ge.s32.totalorder %s490_s12, 4   ;;  %s633_s6 = smov %s440_s7 }
  0x89   : > { %s634_s7 = smov %s444_s8  ;;  %s635_s8 = smov %s502_s15 }
  0x8a   : > { %s636_s9 = smov %s490_s12  ;;  %16 = sbr.rel (!%p14_p3) target bundleno = 5 (0x5), region = 71 }
  0x91   :  { %225 = vsyncpa [#allocation3], 1 }
  0x92   :  { %227 = vsyncpa [#allocation3 + $0x1], 1 }
  0x93   :  { %228 = vsyncpa [#allocation4], 1 }
  0x94   :  { %230 = vsyncpa [#allocation4 + $0x1], 1 }

</bundles_post_ra>
